<compile_context>
chip_gen: v7x
topology: tpu7x:2x2x1
jax: 0.10.0
libtpu: 0.0.40
codegen_flags: <defaults>
</compile_context>

<pallas_src>
import jax
import jax.numpy as jnp
import numpy as np
from jax.experimental import pallas as pl
from jax.experimental.pallas import tpu as pltpu


def _round_up(x, n):
    return ((x + n - 1) // n) * n


def _ensemble_head_kernel(x_ref,    # VMEM (B_pad, D)   flattened input
                          w_ref,    # VMEM (D, TA)      pre-combined head weights tile
                          b_ref,    # VMEM (1, TA)      pre-combined bias tile
                          out_ref): # VMEM (B_pad, TA)  policy|value output tile
    # Single MXU matmul with f32 accumulation; bias add on the VPU.
    out_ref[...] = (
        jnp.dot(x_ref[...], w_ref[...], preferred_element_type=jnp.float32)
        + b_ref[...]
    ).astype(out_ref.dtype)


def model_ensemble_forward(x_nchw, ens_weights, wp, bp, wv, bv, *,
                           action_tile=1024, weight_dtype=None):
    """Ensemble forward.

    Args:
      x_nchw:      (B, C, H, W) float32 input.
      ens_weights: (M,) float32 per-model ensemble weights (fixed per module).
      wp:          (M, D, A) policy head weights.
      bp:          (M, 1, A) policy head biases.
      wv:          (M, D, 1) value head weights.
      bv:          (M, 1, 1) value head biases.
      action_tile: max lane width of one output tile (rounded to 128).
      weight_dtype: optional narrower streaming dtype for x / weights
                    (e.g. jnp.bfloat16). Default None = float32 (exact).

    Returns:
      (policy: (B, A), value: (B, 1)) float32.
    """
    B, C, H, W = x_nchw.shape
    M, D, A = wp.shape
    assert D == C * H * W

    f32 = jnp.float32
    w = ens_weights.astype(f32)

    # ---- pre-combine the M linear heads (exact: the module's op is linear
    # in the per-model outputs). If ens_weights/wp/... are constants under
    # jit, XLA constant-folds this so it costs nothing per call. -------------
    wp_eff = jnp.einsum('m,mda->da', w, wp.astype(f32))   # (D, A)
    bp_eff = jnp.einsum('m,mxa->xa', w, bp.astype(f32))   # (1, A)
    wv_eff = jnp.einsum('m,mdx->dx', w, wv.astype(f32))   # (D, 1)
    bv_eff = jnp.einsum('m,mxy->xy', w, bv.astype(f32))   # (1, 1)

    LANE, SUB = 128, 8
    A_pad = _round_up(A, LANE)
    N_comb = A_pad + LANE            # value column lives at lane index A_pad
    B_pad = _round_up(B, SUB)        # unmasked sublane-dense stores

    # ---- fold policy + value heads into one lane-dense RHS + bias ----------
    rhs = jnp.zeros((D, N_comb), f32)
    rhs = rhs.at[:, :A].set(wp_eff)
    rhs = rhs.at[:, A_pad:A_pad + 1].set(wv_eff)
    bias = jnp.zeros((1, N_comb), f32)
    bias = bias.at[:, :A].set(bp_eff)
    bias = bias.at[:, A_pad:A_pad + 1].set(bv_eff)

    x_flat = x_nchw.reshape(B, D).astype(f32)
    if B_pad != B:
        x_flat = jnp.pad(x_flat, ((0, B_pad - B), (0, 0)))

    if weight_dtype is not None:     # optional bandwidth-saving opt-in
        x_flat = x_flat.astype(weight_dtype)
        rhs = rhs.astype(weight_dtype)
    in_itemsize = jnp.dtype(weight_dtype or f32).itemsize

    # ---- tile sizing: biggest tile that fits a conservative VMEM budget ----
    ta = max(LANE, (int(action_tile) // LANE) * LANE)
    ta = min(ta, N_comb)

    def _block_bytes(t):
        return (2 * D * t * in_itemsize          # rhs tile, double-buffered
                + 2 * t * 4                       # bias tile
                + 2 * B_pad * D * in_itemsize     # x block (constant index_map)
                + 2 * B_pad * t * 4)              # output tile

    VMEM_BUDGET = 24 << 20                        # safe on v5e/v6e/v7x
    while ta > LANE and _block_bytes(ta) > VMEM_BUDGET:
        ta = max(LANE, ((ta // 2) // LANE) * LANE)

    N_pad = _round_up(N_comb, ta)
    if N_pad != N_comb:                           # pad with zero columns
        rhs = jnp.pad(rhs, ((0, 0), (0, N_pad - N_comb)))
        bias = jnp.pad(bias, ((0, 0), (0, N_pad - N_comb)))
    n_tiles = N_pad // ta

    vmem_limit = int(min(64 << 20, max(2 * _block_bytes(ta), 16 << 20)))

    grid_spec = pltpu.PrefetchScalarGridSpec(
        num_scalar_prefetch=0,
        grid=(n_tiles,),
        in_specs=[
            # x: constant index_map -> stays resident across tiles.
            pl.BlockSpec((B_pad, D), lambda j: (0, 0)),
            pl.BlockSpec((D, ta), lambda j: (0, j)),
            pl.BlockSpec((1, ta), lambda j: (0, j)),
        ],
        out_specs=pl.BlockSpec((B_pad, ta), lambda j: (0, j)),
    )

    out_pad = pl.pallas_call(
        _ensemble_head_kernel,
        out_shape=jax.ShapeDtypeStruct((B_pad, N_pad), jnp.float32),
        grid_spec=grid_spec,
        compiler_params=pltpu.CompilerParams(
            # Tiny kernel: keep it on one TensorCore (grid is usually 1 step).
            dimension_semantics=("arbitrary",),
            vmem_limit_bytes=vmem_limit),
    )(x_flat, rhs, bias)

    policy = out_pad[:B, :A]
    value = out_pad[:B, A_pad:A_pad + 1]
    return policy, value


def _reference(x_nchw, ens_weights, wp, bp, wv, bv):
    """Float64 numpy reference mirroring the PyTorch module exactly."""
    B = x_nchw.shape[0]
    x = np.asarray(x_nchw, np.float64).reshape(B, -1)
    w = np.asarray(ens_weights, np.float64)
    pol = np.zeros((B, wp.shape[2]), np.float64)
    val = np.zeros((B, 1), np.float64)
    for m in range(wp.shape[0]):
        pol += w[m] * (x @ np.asarray(wp[m], np.float64)
                       + np.asarray(bp[m], np.float64))
        val += w[m] * (x @ np.asarray(wv[m], np.float64)
                       + np.asarray(bv[m], np.float64))
    return pol, val


if __name__ == "__main__":
    # Small shapes consistent with the module: (batch, channels, height, width)
    B, C, H, W = 2, 4, 16, 16
    D = C * H * W          # 1024
    A = H * W              # 256 actions (one per board cell)
    M = 3                  # number of models in the ensemble

    key = jax.random.PRNGKey(0)
    kx, kwp, kbp, kwv, kbv = jax.random.split(key, 5)

    x = jax.random.normal(kx, (B, C, H, W), dtype=jnp.float32)

    # Deterministic synthetic parameters for the M sub-models.
    wp = 0.05 * jax.random.normal(kwp, (M, D, A), dtype=jnp.float32)
    bp = 0.05 * jax.random.normal(kbp, (M, 1, A), dtype=jnp.float32)
    wv = 0.05 * jax.random.normal(kwv, (M, D, 1), dtype=jnp.float32)
    bv = 0.05 * jax.random.normal(kbv, (M, 1, 1), dtype=jnp.float32)

    # Ensemble weights (like the optional `weights` ctor arg; non-uniform).
    ens_weights = jnp.array([0.5, 0.3, 0.2], dtype=jnp.float32)

    policy, value = model_ensemble_forward(x, ens_weights, wp, bp, wv, bv)
    jax.block_until_ready((policy, value))

    ref_policy, ref_value = _reference(x, ens_weights, wp, bp, wv, bv)
    np.testing.assert_allclose(np.asarray(policy), ref_policy,
                               rtol=5e-3, atol=5e-3)
    np.testing.assert_allclose(np.asarray(value), ref_value,
                               rtol=5e-3, atol=5e-3)

    assert policy.shape == (B, A) and value.shape == (B, 1)
    print("KERNEL_OK")
</pallas_src>

<mosaic_0001>
module attributes {stable_mosaic.version = 11 : i64} {
  func.func @_ensemble_head_kernel(%arg0: i32, %arg1: memref<8x1024xf32, #tpu.memory_space<vmem>>, %arg2: memref<1024x384xf32, #tpu.memory_space<vmem>>, %arg3: memref<1x384xf32, #tpu.memory_space<vmem>>, %arg4: memref<8x384xf32, #tpu.memory_space<vmem>>) attributes {dimension_semantics = [#tpu.dimension_semantics<arbitrary>], iteration_bounds = array<i64: 1>, scalar_prefetch = 0 : i64, scratch_operands = 0 : i64, tpu.core_type = #tpu.core_type<tc>, window_params = [{pipeline_mode = #tpu.pipeline_mode<synchronous>, transform_indices = @transform_0, window_bounds = array<i64: 8, 1024>}, {transform_indices = @transform_1, window_bounds = array<i64: 1024, 384>}, {transform_indices = @transform_2, window_bounds = array<i64: 1, 384>}, {transform_indices = @transform_3, window_bounds = array<i64: 8, 384>}]} {
    %c0 = arith.constant 0 : index
    %c0_0 = arith.constant 0 : index
    %0 = vector.load %arg1[%c0, %c0_0] : memref<8x1024xf32, #tpu.memory_space<vmem>>, vector<8x1024xf32>
    %c0_1 = arith.constant 0 : index
    %c0_2 = arith.constant 0 : index
    %1 = vector.load %arg2[%c0_1, %c0_2] : memref<1024x384xf32, #tpu.memory_space<vmem>>, vector<1024x384xf32>
    %cst = arith.constant dense<0.000000e+00> : vector<8x384xf32>
    %2 = tpu.matmul %0, %1, %cst {dimension_numbers = #tpu.dot_dimension_numbers<[1], [0], [0], [1], [0, 0, 1, 1], [], []>} : vector<8x1024xf32>, vector<1024x384xf32>, vector<8x384xf32> -> vector<8x384xf32>
    %c0_3 = arith.constant 0 : index
    %c0_4 = arith.constant 0 : index
    %3 = vector.load %arg3[%c0_3, %c0_4] : memref<1x384xf32, #tpu.memory_space<vmem>>, vector<1x384xf32>
    %4 = vector.broadcast %3 : vector<1x384xf32> to vector<8x384xf32>
    %5 = arith.addf %2, %4 : vector<8x384xf32>
    %c0_5 = arith.constant 0 : index
    %c0_6 = arith.constant 0 : index
    %6 = vector.load %arg4[%c0_5, %c0_6] : memref<8x384xf32, #tpu.memory_space<vmem>>, vector<8x384xf32>
    tpu.vector_store %arg4[%c0_5, %c0_6], %5 {strides = array<i32>} : memref<8x384xf32, #tpu.memory_space<vmem>>, vector<8x384xf32>,
    return
  }
  func.func @transform_0(%arg0: i32) -> (i32, i32) {
    %c0_i32 = arith.constant 0 : i32
    %c0_i32_0 = arith.constant 0 : i32
    %c0_i32_1 = arith.constant 0 : i32
    return %c0_i32, %c0_i32_0 : i32, i32
  }
  func.func @transform_1(%arg0: i32) -> (i32, i32) {
    %c0_i32 = arith.constant 0 : i32
    %c0_i32_0 = arith.constant 0 : i32
    return %c0_i32, %arg0 : i32, i32
  }
  func.func @transform_2(%arg0: i32) -> (i32, i32) {
    %c0_i32 = arith.constant 0 : i32
    %c0_i32_0 = arith.constant 0 : i32
    return %c0_i32, %arg0 : i32, i32
  }
  func.func @transform_3(%arg0: i32) -> (i32, i32) {
    %c0_i32 = arith.constant 0 : i32
    %c0_i32_0 = arith.constant 0 : i32
    return %c0_i32, %arg0 : i32, i32
  }
}

</mosaic_0001>

<bundles_post_ra>
// kernel: tpu_custom_call.1
= control target key start
LH: loop header
LB: loop body
LE: loop exit
PB: predicated region body
PF: predicated region fallthrough
CT: control target
= control target key end

     0   :  { %8 = vsyncpa [#allocation3], 0  ;;  %s1778_s0 = inlined_call_operand.hbm [shape: f32[8,1024], index: 0, kind: input, shape index: {}]   ;;  %s1779_s1 = inlined_call_operand.hbm [shape: f32[1024,384], index: 1, kind: input, shape index: {}]   ;;  %s1780_s2 = inlined_call_operand.hbm [shape: f32[1,384], index: 2, kind: input, shape index: {}]   ;;  %s1781_s3 = inlined_call_operand.hbm [shape: f32[8,384], index: 3, kind: output, shape index: {}]  }
   0x1   :  { %9 = vsyncpa [#allocation6], 0 }
   0x2   :  { %10 = vsyncpa [#allocation4], 0  ;;  %s1676_s12 = smov [#allocation5]   ;;  %s1582_s16 = scalar_lea.hbm %s1779_s1, 49152 }
   0x3   :  { %s26_s13 = sshll.u32 %s1676_s12, 4  ;;  %p1583_p0 = scmp.ne.s32.totalorder %s1779_s1, %s1582_s16  ;;  %s27_s13 = int_to_ptr.vmem [resolvable:$true] %s26_s13 }
   0x4   :  { %p1586_p1 = scmp.lt.u32.totalorder %s1582_s16, %s1779_s1 }
   0x6   :  { %p1588_p2 = pnand %p1586_p1, %p1583_p0 }
   0x8   :  { %1591 = shalt.err (!%p1588_p2)
}
   0x9   :  { %s1592_s21 = scalar_lea.vmem %s27_s13, 49152  ;;  %p1597_p4 = scmp.lt.s32.totalorder %s27_s13, %s27_s13 }
   0xa   :  { %p1593_p3 = scmp.ne.s32.totalorder %s27_s13, %s1592_s21  ;;  %p1598_p5 = scmp.lt.s32.totalorder %s1592_s21, %s1592_s21 }
   0xc   :  { %p1599_p6 = por %p1598_p5, %p1597_p4 }
   0xe   :  { %p1600_p7 = pnand %p1599_p6, %p1593_p3 }
  0x10   :  { %1603 = shalt.err (!%p1600_p7)
}
  0x11   :  { %s1677_s22 = smov 384   ;;  %s1678_s23 = smov 24  }
  0x12   :  { %32 = dma.hbm_to_vmem [thread:$0]  %s1779_s1, 49152, %s27_s13, [#allocation6], %s1677_s22, %s1677_s22, %s1678_s23  }
  0x13   :  { %s1679_s26 = smov [#allocation2]   ;;  %s1680_s28 = smov [#allocation7]  }
  0x14   :  { %s17_s27 = sshll.u32 %s1679_s26, 4  ;;  %s39_s29 = sshll.u32 %s1680_s28, 4  ;;  %s18_s27 = int_to_ptr.vmem [resolvable:$true] %s17_s27  ;;  %s40_s29 = int_to_ptr.vmem [resolvable:$true] %s39_s29 }
  0x15   :  { %s1604_s5 = scalar_lea.hbm %s1778_s0, 1024 }
  0x16   :  { %p1605_p8 = scmp.ne.s32.totalorder %s1778_s0, %s1604_s5  ;;  %p1608_p9 = scmp.lt.u32.totalorder %s1604_s5, %s1778_s0 }
  0x18   :  { %p1610_p10 = pnand %p1608_p9, %p1605_p8 }
  0x1a   :  { %1613 = shalt.err (!%p1610_p10)
}
  0x1b   :  { %s1614_s1 = scalar_lea.vmem %s18_s27, 1024  ;;  %p1619_p12 = scmp.lt.s32.totalorder %s18_s27, %s18_s27 }
  0x1c   :  { %p1615_p11 = scmp.ne.s32.totalorder %s18_s27, %s1614_s1  ;;  %p1620_p13 = scmp.lt.s32.totalorder %s1614_s1, %s1614_s1 }
  0x1e   :  { %p1621_p0 = por %p1620_p13, %p1619_p12 }
  0x20   :  { %p1622_p1 = pnand %p1621_p0, %p1615_p11 }
  0x22   :  { %1625 = shalt.err (!%p1622_p1)
}
  0x23   :  { %20 = dma.hbm_to_vmem [thread:$0]  %s1778_s0, 1024, %s18_s27, [#allocation3]  }
  0x24   :  { %s1626_s14 = scalar_lea.hbm %s1780_s2, 48 }
  0x25   :  { %p1627_p2 = scmp.ne.s32.totalorder %s1780_s2, %s1626_s14  ;;  %p1630_p3 = scmp.lt.u32.totalorder %s1626_s14, %s1780_s2 }
  0x27   :  { %p1632_p4 = pnand %p1630_p3, %p1627_p2 }
  0x29   :  { %1635 = shalt.err (!%p1632_p4)
}
  0x2a   :  { %s1636_s19 = scalar_lea.vmem %s40_s29, 48  ;;  %s1640_s20 = scalar_lea.vmem %s40_s29, 64 }
  0x2b   :  { %p1637_p5 = scmp.ne.s32.totalorder %s40_s29, %s1636_s19  ;;  %p1641_p6 = scmp.lt.s32.totalorder %s40_s29, %s40_s29 }
  0x2c   :  { %p1642_p7 = scmp.lt.s32.totalorder %s1640_s20, %s1636_s19 }
  0x2e   :  { %p1643_p8 = por %p1642_p7, %p1641_p6 }
  0x30   :  { %p1644_p9 = pnand %p1643_p8, %p1637_p5 }
  0x32   :  { %1647 = shalt.err (!%p1644_p9)
}
  0x33   :  { %42 = dma.hbm_to_vmem [thread:$0]  %s1780_s2, 48, %s40_s29, [#allocation6]  }
  0x34   :  { %1670 = dma.done.wait [#allocation3], 1024  }
  0x35   :  { %1671 = vsyncadd [#allocation3], 4294966272 }
  0x36   :  { %1672 = dma.done.wait [#allocation6], 49200  }
  0x37   :  { %1673 = vsyncadd [#allocation6], 4294918096  ;;  %v61_v0 = vld [vmem:[#allocation5 + $0x8] sm:$0xff]  ;;  %v64_v1 = vld [vmem:[#allocation5 + $0x20] sm:$0xff]  ;;  %s1681_s2 = smov [#allocation8]  }
  0x38   :  { %v157_v2 = vld [vmem:[#allocation5 + $0x308] sm:$0xff]  ;;  %v1184_v3 = vpack.c.bf16 %v64_v1, %v61_v0  ;;  %v160_v4 = vld [vmem:[#allocation5 + $0x320] sm:$0xff]  ;;  %v63_v6 = vld [vmem:[#allocation5 + $0x18] sm:$0xff]  ;;  %s1034_s22 = sshll.u32 %s1681_s2, 4  ;;  %s1035_s22 = int_to_ptr.vmem [resolvable:$true] %s1034_s22 }
  0x39   :  { %v60_v5 = vld [vmem:[#allocation5] sm:$0xff]  ;;  %v1248_v7 = vpack.c.bf16 %v160_v4, %v157_v2  ;;  %v159_v10 = vld [vmem:[#allocation5 + $0x318] sm:$0xff]  ;;  %v70_v13 = vld [vmem:[#allocation5 + $0x50] sm:$0xff]  ;;  %s1648_s23 = scalar_lea.vmem %s1035_s22, 384  ;;  %p1653_p11 = scmp.lt.s32.totalorder %s1035_s22, %s1035_s22 }
  0x3a   :  { %v1186_v8 = vpack.c.bf16 %v63_v6, %v60_v5  ;;  %v156_v9 = vld [vmem:[#allocation5 + $0x300] sm:$0xff]  ;;  %v67_v11 = vld [vmem:[#allocation5 + $0x38] sm:$0xff]  ;;  %1185 = vmatprep.subr.bf16.mxu1 %v1184_v3  ;;  %v166_v15 = vld [vmem:[#allocation5 + $0x350] sm:$0xff]  ;;  %p1649_p10 = scmp.ne.s32.totalorder %s1035_s22, %s1648_s23  ;;  %p1654_p12 = scmp.lt.s32.totalorder %s1648_s23, %s1648_s23 }
  0x3b   :  { %v1250_v12 = vpack.c.bf16 %v159_v10, %v156_v9  ;;  %v163_v14 = vld [vmem:[#allocation5 + $0x338] sm:$0xff]  ;;  %1249 = vmatprep.subr.bf16.mxu0 %v1248_v7  ;;  %v1188_v16 = vpack.c.bf16 %v70_v13, %v67_v11  ;;  %v66_v18 = vld [vmem:[#allocation5 + $0x30] sm:$0xff]  ;;  %v69_v19 = vld [vmem:[#allocation5 + $0x48] sm:$0xff] }
  0x3c   :  { %1187 = vmatpush1.bf16.msra.mxu1 %v1186_v8  ;;  %v1252_v17 = vpack.c.bf16 %v166_v15, %v163_v14  ;;  %v162_v20 = vld [vmem:[#allocation5 + $0x330] sm:$0xff]  ;;  %v1190_v21 = vpack.c.bf16 %v69_v19, %v66_v18  ;;  %v165_v22 = vld [vmem:[#allocation5 + $0x348] sm:$0xff]  ;;  %v76_v24 = vld [vmem:[#allocation5 + $0x80] sm:$0xff]  ;;  %p1655_p13 = por %p1654_p12, %p1653_p11 }
  0x3d   :  { %1251 = vmatpush1.bf16.msra.mxu0 %v1250_v12  ;;  %v73_v23 = vld [vmem:[#allocation5 + $0x68] sm:$0xff]  ;;  %1189 = vmatprep.subr.bf16.mxu1 %v1188_v16  ;;  %v1254_v25 = vpack.c.bf16 %v165_v22, %v162_v20  ;;  %v172_v28 = vld [vmem:[#allocation5 + $0x380] sm:$0xff]  ;;  %v75_v31 = vld [vmem:[#allocation5 + $0x78] sm:$0xff] }
  0x3e   :  { %1253 = vmatprep.subr.bf16.mxu0 %v1252_v17  ;;  %v1192_v26 = vpack.c.bf16 %v76_v24, %v73_v23  ;;  %v169_v27 = vld [vmem:[#allocation5 + $0x368] sm:$0xff]  ;;  %v72_v29 = vld [vmem:[#allocation5 + $0x60] sm:$0xff]  ;;  %v171_v33 = vld [vmem:[#allocation5 + $0x378] sm:$0xff]  ;;  %p1656_p0 = pnand %p1655_p13, %p1649_p10 }
  0x3f   :  { %v1256_v30 = vpack.c.bf16 %v172_v28, %v169_v27  ;;  %v168_v32 = vld [vmem:[#allocation5 + $0x360] sm:$0xff]  ;;  %v1194_v34 = vpack.c.bf16 %v75_v31, %v72_v29  ;;  %v79_v35 = vld [vmem:[#allocation5 + $0x98] sm:$0xff]  ;;  %v82_v36 = vld [vmem:[#allocation5 + $0xb0] sm:$0xff] }
  0x40   :  { %1191 = vmatpush1.bf16.msra.mxu1 %v1190_v21  ;;  %v175_v37 = vld [vmem:[#allocation5 + $0x398] sm:$0xff]  ;;  %v1258_v38 = vpack.c.bf16 %v171_v33, %v168_v32  ;;  %v1196_v39 = vpack.c.bf16 %v82_v36, %v79_v35  ;;  %v178_v40 = vld [vmem:[#allocation5 + $0x3b0] sm:$0xff]  ;;  %v81_v42 = vld [vmem:[#allocation5 + $0xa8] sm:$0xff] }
  0x41   :  { %1255 = vmatpush1.bf16.msra.mxu0 %v1254_v25  ;;  %1193 = vmatprep.subr.bf16.mxu1 %v1192_v26  ;;  %v78_v41 = vld [vmem:[#allocation5 + $0x90] sm:$0xff]  ;;  %v1260_v43 = vpack.c.bf16 %v178_v40, %v175_v37  ;;  %v177_v45 = vld [vmem:[#allocation5 + $0x3a8] sm:$0xff]  ;;  %v88_v47 = vld [vmem:[#allocation5 + $0xe0] sm:$0xff] }
  0x42   :  { %1257 = vmatprep.subr.bf16.mxu0 %v1256_v30  ;;  %v174_v44 = vld [vmem:[#allocation5 + $0x390] sm:$0xff]  ;;  %v85_v46 = vld [vmem:[#allocation5 + $0xc8] sm:$0xff]  ;;  %v184_v49 = vld [vmem:[#allocation5 + $0x3e0] sm:$0xff]  ;;  %v1198_v50 = vpack.c.bf16 %v81_v42, %v78_v41 }
  0x43   :  { %v181_v48 = vld [vmem:[#allocation5 + $0x3c8] sm:$0xff]  ;;  %v1262_v51 = vpack.c.bf16 %v177_v45, %v174_v44  ;;  %v1200_v52 = vpack.c.bf16 %v88_v47, %v85_v46  ;;  %v84_v53 = vld [vmem:[#allocation5 + $0xc0] sm:$0xff]  ;;  %v87_v54 = vld [vmem:[#allocation5 + $0xd8] sm:$0xff] }
  0x44   :  { %1195 = vmatpush1.bf16.msra.mxu1 %v1194_v34  ;;  %v180_v55 = vld [vmem:[#allocation5 + $0x3c0] sm:$0xff]  ;;  %v1264_v56 = vpack.c.bf16 %v184_v49, %v181_v48  ;;  %v183_v57 = vld [vmem:[#allocation5 + $0x3d8] sm:$0xff]  ;;  %v94_v59 = vld [vmem:[#allocation5 + $0x110] sm:$0xff]  ;;  %v1202_v62 = vpack.c.bf16 %v87_v54, %v84_v53 }
  0x45   :  { %1259 = vmatpush1.bf16.msra.mxu0 %v1258_v38  ;;  %1197 = vmatprep.subr.bf16.mxu1 %v1196_v39  ;;  %v91_v58 = vld [vmem:[#allocation5 + $0xf8] sm:$0xff]  ;;  %v190_v61 = vld [vmem:[#allocation5 + $0x410] sm:$0xff]  ;;  %v1266_v63 = vpack.c.bf16 %v183_v57, %v180_v55  ;;  %v93_v2 = vld [vmem:[#allocation5 + $0x108] sm:$0xff] }
  0x46   :  { %1261 = vmatprep.subr.bf16.mxu0 %v1260_v43  ;;  %v187_v60 = vld [vmem:[#allocation5 + $0x3f8] sm:$0xff]  ;;  %v1204_v0 = vpack.c.bf16 %v94_v59, %v91_v58  ;;  %v90_v1 = vld [vmem:[#allocation5 + $0xf0] sm:$0xff]  ;;  %v189_v5 = vld [vmem:[#allocation5 + $0x408] sm:$0xff] }
  0x47   :  { %v186_v3 = vld [vmem:[#allocation5 + $0x3f0] sm:$0xff]  ;;  %v1268_v4 = vpack.c.bf16 %v190_v61, %v187_v60  ;;  %v97_v6 = vld [vmem:[#allocation5 + $0x128] sm:$0xff]  ;;  %v100_v7 = vld [vmem:[#allocation5 + $0x140] sm:$0xff]  ;;  %v1206_v10 = vpack.c.bf16 %v93_v2, %v90_v1 }
  0x48   :  { %1199 = vmatpush1.bf16.msra.mxu1 %v1198_v50  ;;  %v193_v8 = vld [vmem:[#allocation5 + $0x428] sm:$0xff]  ;;  %v196_v9 = vld [vmem:[#allocation5 + $0x440] sm:$0xff]  ;;  %v1270_v11 = vpack.c.bf16 %v189_v5, %v186_v3  ;;  %v1208_v12 = vpack.c.bf16 %v100_v7, %v97_v6  ;;  %v99_v14 = vld [vmem:[#allocation5 + $0x138] sm:$0xff] }
  0x49   :  { %1263 = vmatpush1.bf16.msra.mxu0 %v1262_v51  ;;  %1201 = vmatprep.subr.bf16.mxu1 %v1200_v52  ;;  %v96_v13 = vld [vmem:[#allocation5 + $0x120] sm:$0xff]  ;;  %v1272_v16 = vpack.c.bf16 %v196_v9, %v193_v8  ;;  %v195_v17 = vld [vmem:[#allocation5 + $0x438] sm:$0xff]  ;;  %v106_v19 = vld [vmem:[#allocation5 + $0x170] sm:$0xff] }
  0x4a   :  { %1265 = vmatprep.subr.bf16.mxu0 %v1264_v56  ;;  %v192_v15 = vld [vmem:[#allocation5 + $0x420] sm:$0xff]  ;;  %v103_v18 = vld [vmem:[#allocation5 + $0x158] sm:$0xff]  ;;  %v202_v21 = vld [vmem:[#allocation5 + $0x470] sm:$0xff]  ;;  %v1210_v22 = vpack.c.bf16 %v99_v14, %v96_v13 }
  0x4b   :  { %v199_v20 = vld [vmem:[#allocation5 + $0x458] sm:$0xff]  ;;  %v1274_v23 = vpack.c.bf16 %v195_v17, %v192_v15  ;;  %v1212_v24 = vpack.c.bf16 %v106_v19, %v103_v18  ;;  %v102_v25 = vld [vmem:[#allocation5 + $0x150] sm:$0xff]  ;;  %v105_v26 = vld [vmem:[#allocation5 + $0x168] sm:$0xff] }
  0x4c   :  { %1203 = vmatpush1.bf16.msra.mxu1 %v1202_v62  ;;  %v198_v27 = vld [vmem:[#allocation5 + $0x450] sm:$0xff]  ;;  %v1276_v28 = vpack.c.bf16 %v202_v21, %v199_v20  ;;  %v201_v29 = vld [vmem:[#allocation5 + $0x468] sm:$0xff]  ;;  %v112_v31 = vld [vmem:[#allocation5 + $0x1a0] sm:$0xff]  ;;  %v1214_v34 = vpack.c.bf16 %v105_v26, %v102_v25 }
  0x4d   :  { %1267 = vmatpush1.bf16.msra.mxu0 %v1266_v63  ;;  %1205 = vmatprep.subr.bf16.mxu1 %v1204_v0  ;;  %v109_v30 = vld [vmem:[#allocation5 + $0x188] sm:$0xff]  ;;  %v208_v33 = vld [vmem:[#allocation5 + $0x4a0] sm:$0xff]  ;;  %v1278_v35 = vpack.c.bf16 %v201_v29, %v198_v27  ;;  %v111_v38 = vld [vmem:[#allocation5 + $0x198] sm:$0xff] }
  0x4e   :  { %1269 = vmatprep.subr.bf16.mxu0 %v1268_v4  ;;  %v205_v32 = vld [vmem:[#allocation5 + $0x488] sm:$0xff]  ;;  %v1216_v36 = vpack.c.bf16 %v112_v31, %v109_v30  ;;  %v108_v37 = vld [vmem:[#allocation5 + $0x180] sm:$0xff]  ;;  %v207_v41 = vld [vmem:[#allocation5 + $0x498] sm:$0xff] }
  0x4f   :  { %v204_v39 = vld [vmem:[#allocation5 + $0x480] sm:$0xff]  ;;  %v1280_v40 = vpack.c.bf16 %v208_v33, %v205_v32  ;;  %v115_v42 = vld [vmem:[#allocation5 + $0x1b8] sm:$0xff]  ;;  %v118_v43 = vld [vmem:[#allocation5 + $0x1d0] sm:$0xff]  ;;  %v1218_v46 = vpack.c.bf16 %v111_v38, %v108_v37 }
  0x50   :  { %1207 = vmatpush1.bf16.msra.mxu1 %v1206_v10  ;;  %v211_v44 = vld [vmem:[#allocation5 + $0x4b8] sm:$0xff]  ;;  %v214_v45 = vld [vmem:[#allocation5 + $0x4d0] sm:$0xff]  ;;  %v1282_v47 = vpack.c.bf16 %v207_v41, %v204_v39  ;;  %v1220_v48 = vpack.c.bf16 %v118_v43, %v115_v42  ;;  %v117_v50 = vld [vmem:[#allocation5 + $0x1c8] sm:$0xff] }
  0x51   :  { %1271 = vmatpush1.bf16.msra.mxu0 %v1270_v11  ;;  %1209 = vmatprep.subr.bf16.mxu1 %v1208_v12  ;;  %v114_v49 = vld [vmem:[#allocation5 + $0x1b0] sm:$0xff]  ;;  %v1284_v52 = vpack.c.bf16 %v214_v45, %v211_v44  ;;  %v213_v53 = vld [vmem:[#allocation5 + $0x4c8] sm:$0xff]  ;;  %v124_v55 = vld [vmem:[#allocation5 + $0x200] sm:$0xff] }
  0x52   :  { %1273 = vmatprep.subr.bf16.mxu0 %v1272_v16  ;;  %v210_v51 = vld [vmem:[#allocation5 + $0x4b0] sm:$0xff]  ;;  %v121_v54 = vld [vmem:[#allocation5 + $0x1e8] sm:$0xff]  ;;  %v220_v57 = vld [vmem:[#allocation5 + $0x500] sm:$0xff]  ;;  %v1222_v58 = vpack.c.bf16 %v117_v50, %v114_v49 }
  0x53   :  { %v217_v56 = vld [vmem:[#allocation5 + $0x4e8] sm:$0xff]  ;;  %v1286_v59 = vpack.c.bf16 %v213_v53, %v210_v51  ;;  %v1224_v60 = vpack.c.bf16 %v124_v55, %v121_v54  ;;  %v120_v61 = vld [vmem:[#allocation5 + $0x1e0] sm:$0xff]  ;;  %v123_v62 = vld [vmem:[#allocation5 + $0x1f8] sm:$0xff] }
  0x54   :  { %1211 = vmatpush1.bf16.msra.mxu1 %v1210_v22  ;;  %v216_v63 = vld [vmem:[#allocation5 + $0x4e0] sm:$0xff]  ;;  %v1288_v0 = vpack.c.bf16 %v220_v57, %v217_v56  ;;  %v219_v1 = vld [vmem:[#allocation5 + $0x4f8] sm:$0xff]  ;;  %v130_v3 = vld [vmem:[#allocation5 + $0x230] sm:$0xff]  ;;  %v1226_v6 = vpack.c.bf16 %v123_v62, %v120_v61 }
  0x55   :  { %1275 = vmatpush1.bf16.msra.mxu0 %v1274_v23  ;;  %1213 = vmatprep.subr.bf16.mxu1 %v1212_v24  ;;  %v127_v2 = vld [vmem:[#allocation5 + $0x218] sm:$0xff]  ;;  %v226_v5 = vld [vmem:[#allocation5 + $0x530] sm:$0xff]  ;;  %v1290_v8 = vpack.c.bf16 %v219_v1, %v216_v63  ;;  %v129_v10 = vld [vmem:[#allocation5 + $0x228] sm:$0xff] }
  0x56   :  { %1277 = vmatprep.subr.bf16.mxu0 %v1276_v28  ;;  %v223_v4 = vld [vmem:[#allocation5 + $0x518] sm:$0xff]  ;;  %v126_v7 = vld [vmem:[#allocation5 + $0x210] sm:$0xff]  ;;  %v1228_v9 = vpack.c.bf16 %v130_v3, %v127_v2  ;;  %v225_v12 = vld [vmem:[#allocation5 + $0x528] sm:$0xff] }
  0x57   :  { %v222_v11 = vld [vmem:[#allocation5 + $0x510] sm:$0xff]  ;;  %v1292_v13 = vpack.c.bf16 %v226_v5, %v223_v4  ;;  %v133_v14 = vld [vmem:[#allocation5 + $0x248] sm:$0xff]  ;;  %v136_v15 = vld [vmem:[#allocation5 + $0x260] sm:$0xff]  ;;  %v1230_v20 = vpack.c.bf16 %v129_v10, %v126_v7 }
  0x58   :  { %1215 = vmatpush1.bf16.msra.mxu1 %v1214_v34  ;;  %v1738_v16 = vld [vmem:[#allocation2 + $0x8] sm:$0xff]  ;;  %v232_v18 = vld [vmem:[#allocation5 + $0x560] sm:$0xff]  ;;  %v1741_v19 = vld [vmem:[#allocation2 + $0x18] sm:$0xff]  ;;  %v1294_v21 = vpack.c.bf16 %v225_v12, %v222_v11  ;;  %v1232_v22 = vpack.c.bf16 %v136_v15, %v133_v14 }
  0x59   :  { %1279 = vmatpush1.bf16.msra.mxu0 %v1278_v35  ;;  %1217 = vmatprep.subr.bf16.mxu1 %v1216_v36  ;;  %v229_v17 = vld [vmem:[#allocation5 + $0x548] sm:$0xff]  ;;  %v132_v23 = vld [vmem:[#allocation5 + $0x240] sm:$0xff]  ;;  %v135_v24 = vld [vmem:[#allocation5 + $0x258] sm:$0xff] }
  0x5a   :  { %1281 = vmatprep.subr.bf16.mxu0 %v1280_v40  ;;  %525 = vmatprep.mubr.f32.mxu1 %v1738_v16  ;;  %v228_v25 = vld [vmem:[#allocation5 + $0x540] sm:$0xff]  ;;  %v1296_v26 = vpack.c.bf16 %v232_v18, %v229_v17  ;;  %v231_v27 = vld [vmem:[#allocation5 + $0x558] sm:$0xff]  ;;  %v142_v29 = vld [vmem:[#allocation5 + $0x290] sm:$0xff]  ;;  %v1234_v32 = vpack.c.bf16 %v135_v24, %v132_v23 }
  0x5b   :  { %596 = vmatprep.mubr.f32.mxu0 %v1741_v19  ;;  %v139_v28 = vld [vmem:[#allocation5 + $0x278] sm:$0xff]  ;;  %v238_v31 = vld [vmem:[#allocation5 + $0x590] sm:$0xff]  ;;  %v1298_v33 = vpack.c.bf16 %v231_v27, %v228_v25  ;;  %v141_v36 = vld [vmem:[#allocation5 + $0x288] sm:$0xff] }
  0x5c   :  { %1219 = vmatpush1.bf16.msra.mxu1 %v1218_v46  ;;  %v235_v30 = vld [vmem:[#allocation5 + $0x578] sm:$0xff]  ;;  %v1236_v34 = vpack.c.bf16 %v142_v29, %v139_v28  ;;  %v138_v35 = vld [vmem:[#allocation5 + $0x270] sm:$0xff]  ;;  %v237_v39 = vld [vmem:[#allocation5 + $0x588] sm:$0xff] }
  0x5d   :  { %1283 = vmatpush1.bf16.msra.mxu0 %v1282_v47  ;;  %1221 = vmatprep.subr.bf16.mxu1 %v1220_v48  ;;  %v234_v37 = vld [vmem:[#allocation5 + $0x570] sm:$0xff]  ;;  %v1300_v38 = vpack.c.bf16 %v238_v31, %v235_v30  ;;  %v145_v40 = vld [vmem:[#allocation5 + $0x2a8] sm:$0xff]  ;;  %v148_v41 = vld [vmem:[#allocation5 + $0x2c0] sm:$0xff]  ;;  %v1238_v44 = vpack.c.bf16 %v141_v36, %v138_v35 }
  0x5e   :  { %1285 = vmatprep.subr.bf16.mxu0 %v1284_v52  ;;  %v241_v42 = vld [vmem:[#allocation5 + $0x5a8] sm:$0xff]  ;;  %v244_v43 = vld [vmem:[#allocation5 + $0x5c0] sm:$0xff]  ;;  %v1302_v45 = vpack.c.bf16 %v237_v39, %v234_v37  ;;  %v1240_v46 = vpack.c.bf16 %v148_v41, %v145_v40  ;;  %v147_v48 = vld [vmem:[#allocation5 + $0x2b8] sm:$0xff] }
  0x5f   :  { %v144_v47 = vld [vmem:[#allocation5 + $0x2a0] sm:$0xff]  ;;  %v1304_v50 = vpack.c.bf16 %v244_v43, %v241_v42  ;;  %v243_v51 = vld [vmem:[#allocation5 + $0x5b8] sm:$0xff]  ;;  %v154_v53 = vld [vmem:[#allocation5 + $0x2f0] sm:$0xff] }
  0x60   :  { %1223 = vmatpush1.bf16.msra.mxu1 %v1222_v58  ;;  %v240_v49 = vld [vmem:[#allocation5 + $0x5a0] sm:$0xff]  ;;  %v151_v52 = vld [vmem:[#allocation5 + $0x2d8] sm:$0xff]  ;;  %v250_v55 = vld [vmem:[#allocation5 + $0x5f0] sm:$0xff]  ;;  %v1242_v56 = vpack.c.bf16 %v147_v48, %v144_v47 }
  0x61   :  { %1287 = vmatpush1.bf16.msra.mxu0 %v1286_v59  ;;  %1225 = vmatprep.subr.bf16.mxu1 %v1224_v60  ;;  %v247_v54 = vld [vmem:[#allocation5 + $0x5d8] sm:$0xff]  ;;  %v1306_v57 = vpack.c.bf16 %v243_v51, %v240_v49  ;;  %v1244_v58 = vpack.c.bf16 %v154_v53, %v151_v52  ;;  %v150_v59 = vld [vmem:[#allocation5 + $0x2d0] sm:$0xff]  ;;  %v153_v60 = vld [vmem:[#allocation5 + $0x2e8] sm:$0xff] }
  0x62   :  { %1289 = vmatprep.subr.bf16.mxu0 %v1288_v0  ;;  %v246_v61 = vld [vmem:[#allocation5 + $0x5d0] sm:$0xff]  ;;  %v1308_v62 = vpack.c.bf16 %v250_v55, %v247_v54  ;;  %v249_v63 = vld [vmem:[#allocation5 + $0x5e8] sm:$0xff]  ;;  %v256_v3 = vld [vmem:[#allocation5 + $0x620] sm:$0xff]  ;;  %v1246_v4 = vpack.c.bf16 %v153_v60, %v150_v59 }
  0x63   :  { %v110_v0 = vld [vmem:[#allocation5 + $0x190] sm:$0xff]  ;;  %v113_v1 = vld [vmem:[#allocation5 + $0x1a8] sm:$0xff]  ;;  %v1310_v5 = vpack.c.bf16 %v249_v63, %v246_v61  ;;  %v252_v7 = vld [vmem:[#allocation5 + $0x600] sm:$0xff] }
  0x64   :  { %1227 = vmatpush1.bf16.msra.mxu1 %v1226_v6  ;;  %v253_v2 = vld [vmem:[#allocation5 + $0x608] sm:$0xff]  ;;  %v1440_v6 = vpack.c.bf16 %v113_v1, %v110_v0  ;;  %v255_v11 = vld [vmem:[#allocation5 + $0x618] sm:$0xff]  ;;  %v116_v12 = vld [vmem:[#allocation5 + $0x1c0] sm:$0xff] }
  0x65   :  { %1291 = vmatpush1.bf16.msra.mxu0 %v1290_v8  ;;  %1229 = vmatprep.subr.bf16.mxu1 %v1228_v9  ;;  %v62_v8 = vld [vmem:[#allocation5 + $0x10] sm:$0xff]  ;;  %v65_v9 = vld [vmem:[#allocation5 + $0x28] sm:$0xff]  ;;  %v1312_v10 = vpack.c.bf16 %v256_v3, %v253_v2  ;;  %v259_v14 = vld [vmem:[#allocation5 + $0x638] sm:$0xff] }
  0x66   :  { %1293 = vmatprep.subr.bf16.mxu0 %v1292_v13  ;;  %v119_v13 = vld [vmem:[#allocation5 + $0x1d8] sm:$0xff]  ;;  %v262_v15 = vld [vmem:[#allocation5 + $0x650] sm:$0xff]  ;;  %v1744_v17 = vld [vmem:[#allocation2] sm:$0xff] }
  0x67   :  { %v1746_v18 = vld [vmem:[#allocation2 + $0x10] sm:$0xff]  ;;  %v68_v24 = vld [vmem:[#allocation5 + $0x40] sm:$0xff]  ;;  %v71_v25 = vld [vmem:[#allocation5 + $0x58] sm:$0xff] }
  0x68   :  { %1231 = vmatpush1.bf16.msra.mxu1 %v1230_v20  ;;  %v1442_v20 = vpack.c.bf16 %v65_v9, %v62_v8  ;;  %v258_v23 = vld [vmem:[#allocation5 + $0x630] sm:$0xff]  ;;  %v261_v27 = vld [vmem:[#allocation5 + $0x648] sm:$0xff]  ;;  %v268_v31 = vld [vmem:[#allocation5 + $0x680] sm:$0xff] }
  0x69   :  { %1295 = vmatpush1.bf16.msra.mxu0 %v1294_v21  ;;  %1233 = vmatprep.subr.bf16.mxu1 %v1232_v22  ;;  %v1314_v21 = vpack.c.bf16 %v255_v11, %v252_v7  ;;  %v1444_v22 = vpack.c.bf16 %v119_v13, %v116_v12  ;;  %v122_v28 = vld [vmem:[#allocation5 + $0x1f0] sm:$0xff]  ;;  %v125_v29 = vld [vmem:[#allocation5 + $0x208] sm:$0xff]  ;;  %v264_v35 = vld [vmem:[#allocation5 + $0x660] sm:$0xff] }
  0x6a   :  { %1297 = vmatprep.subr.bf16.mxu0 %v1296_v26  ;;  %v1316_v26 = vpack.c.bf16 %v262_v15, %v259_v14  ;;  %v265_v30 = vld [vmem:[#allocation5 + $0x668] sm:$0xff]  ;;  %v74_v36 = vld [vmem:[#allocation5 + $0x70] sm:$0xff]  ;;  %v267_v39 = vld [vmem:[#allocation5 + $0x678] sm:$0xff] }
  0x6b   :  { %v77_v37 = vld [vmem:[#allocation5 + $0x88] sm:$0xff]  ;;  %v128_v40 = vld [vmem:[#allocation5 + $0x220] sm:$0xff]  ;;  %v131_v41 = vld [vmem:[#allocation5 + $0x238] sm:$0xff] }
  0x6c   :  { %1235 = vmatpush1.bf16.msra.mxu1 %v1234_v32  ;;  %v1446_v32 = vpack.c.bf16 %v71_v25, %v68_v24  ;;  %v271_v42 = vld [vmem:[#allocation5 + $0x698] sm:$0xff]  ;;  %v274_v43 = vld [vmem:[#allocation5 + $0x6b0] sm:$0xff]  ;;  %v80_v48 = vld [vmem:[#allocation5 + $0xa0] sm:$0xff] }
  0x6d   :  { %1299 = vmatpush1.bf16.msra.mxu0 %v1298_v33  ;;  %1237 = vmatprep.subr.bf16.mxu1 %v1236_v34  ;;  %v1318_v33 = vpack.c.bf16 %v261_v27, %v258_v23  ;;  %v1448_v34 = vpack.c.bf16 %v125_v29, %v122_v28  ;;  %v270_v47 = vld [vmem:[#allocation5 + $0x690] sm:$0xff]  ;;  %v83_v49 = vld [vmem:[#allocation5 + $0xb8] sm:$0xff]  ;;  %v273_v51 = vld [vmem:[#allocation5 + $0x6a8] sm:$0xff] }
  0x6e   :  { %1301 = vmatprep.subr.bf16.mxu0 %v1300_v38  ;;  %v1320_v38 = vpack.c.bf16 %v268_v31, %v265_v30  ;;  %v134_v52 = vld [vmem:[#allocation5 + $0x250] sm:$0xff]  ;;  %v137_v53 = vld [vmem:[#allocation5 + $0x268] sm:$0xff]  ;;  %v280_v55 = vld [vmem:[#allocation5 + $0x6e0] sm:$0xff] }
  0x6f   :  { %v277_v54 = vld [vmem:[#allocation5 + $0x6c8] sm:$0xff]  ;;  %v86_v59 = vld [vmem:[#allocation5 + $0xd0] sm:$0xff]  ;;  %v140_v63 = vld [vmem:[#allocation5 + $0x280] sm:$0xff] }
  0x70   :  { %1239 = vmatpush1.bf16.msra.mxu1 %v1238_v44  ;;  %v1450_v44 = vpack.c.bf16 %v77_v37, %v74_v36  ;;  %v89_v60 = vld [vmem:[#allocation5 + $0xe8] sm:$0xff]  ;;  %v1328_v61 = vpack.c.bf16 %v280_v55, %v277_v54  ;;  %v143_v0 = vld [vmem:[#allocation5 + $0x298] sm:$0xff]  ;;  %v286_v2 = vld [vmem:[#allocation5 + $0x710] sm:$0xff] }
  0x71   :  { %1303 = vmatpush1.bf16.msra.mxu0 %v1302_v45  ;;  %1241 = vmatprep.subr.bf16.mxu1 %v1240_v46  ;;  %v1322_v45 = vpack.c.bf16 %v267_v39, %v264_v35  ;;  %v1452_v46 = vpack.c.bf16 %v131_v41, %v128_v40  ;;  %v283_v1 = vld [vmem:[#allocation5 + $0x6f8] sm:$0xff]  ;;  %v1458_v3 = vpack.c.bf16 %v89_v60, %v86_v59  ;;  %v92_v7 = vld [vmem:[#allocation5 + $0x100] sm:$0xff]  ;;  %v146_v11 = vld [vmem:[#allocation5 + $0x2b0] sm:$0xff] }
  0x72   :  { %1305 = vmatprep.subr.bf16.mxu0 %v1304_v50  ;;  %v1324_v50 = vpack.c.bf16 %v274_v43, %v271_v42  ;;  %v95_v8 = vld [vmem:[#allocation5 + $0x118] sm:$0xff]  ;;  %v1332_v9 = vpack.c.bf16 %v286_v2, %v283_v1  ;;  %v149_v12 = vld [vmem:[#allocation5 + $0x2c8] sm:$0xff]  ;;  %v292_v14 = vld [vmem:[#allocation5 + $0x740] sm:$0xff] }
  0x73   :  { %v289_v13 = vld [vmem:[#allocation5 + $0x728] sm:$0xff]  ;;  %v1462_v15 = vpack.c.bf16 %v95_v8, %v92_v7  ;;  %v291_v23 = vld [vmem:[#allocation5 + $0x738] sm:$0xff]  ;;  %v98_v24 = vld [vmem:[#allocation5 + $0x130] sm:$0xff] }
  0x74   :  { %1243 = vmatpush1.bf16.msra.mxu1 %v1242_v56  ;;  %v1326_v56 = vpack.c.bf16 %v273_v51, %v270_v47  ;;  %v101_v25 = vld [vmem:[#allocation5 + $0x148] sm:$0xff]  ;;  %v152_v27 = vld [vmem:[#allocation5 + $0x2e0] sm:$0xff]  ;;  %v155_v28 = vld [vmem:[#allocation5 + $0x2f8] sm:$0xff] }
  0x75   :  { %1307 = vmatpush1.bf16.msra.mxu0 %v1306_v57  ;;  %1245 = vmatprep.subr.bf16.mxu1 %v1244_v58  ;;  %v1456_v57 = vpack.c.bf16 %v137_v53, %v134_v52  ;;  %v276_v58 = vld [vmem:[#allocation5 + $0x6c0] sm:$0xff]  ;;  %v1751_v29 = vld [vmem:[#allocation2 + $0x28] sm:$0xff]  ;;  %v295_v30 = vld [vmem:[#allocation5 + $0x758] sm:$0xff] }
  0x76   :  { %1309 = vmatprep.subr.bf16.mxu0 %v1308_v62  ;;  %v279_v62 = vld [vmem:[#allocation5 + $0x6d8] sm:$0xff]  ;;  %v298_v31 = vld [vmem:[#allocation5 + $0x770] sm:$0xff]  ;;  %v104_v36 = vld [vmem:[#allocation5 + $0x160] sm:$0xff] }
  0x77   :  { %v294_v35 = vld [vmem:[#allocation5 + $0x750] sm:$0xff]  ;;  %v107_v37 = vld [vmem:[#allocation5 + $0x178] sm:$0xff]  ;;  %v297_v39 = vld [vmem:[#allocation5 + $0x768] sm:$0xff] }
  0x78   :  { %1247 = vmatpush1.bf16.msra.mxu1 %v1246_v4  ;;  %v1330_v4 = vpack.c.bf16 %v279_v62, %v276_v58  ;;  %v206_v40 = vld [vmem:[#allocation5 + $0x490] sm:$0xff]  ;;  %v209_v41 = vld [vmem:[#allocation5 + $0x4a8] sm:$0xff]  ;;  %v304_v43 = vld [vmem:[#allocation5 + $0x7a0] sm:$0xff] }
  0x79   :  { %1311 = vmatpush1.bf16.msra.mxu0 %v1310_v5  ;;  %1441 = vmatprep.subr.bf16.mxu1 %v1440_v6  ;;  %v1460_v5 = vpack.c.bf16 %v143_v0, %v140_v63  ;;  %v282_v6 = vld [vmem:[#allocation5 + $0x6f0] sm:$0xff]  ;;  %v301_v42 = vld [vmem:[#allocation5 + $0x788] sm:$0xff]  ;;  %v300_v47 = vld [vmem:[#allocation5 + $0x780] sm:$0xff] }
  0x7a   :  { %1313 = vmatprep.subr.bf16.mxu0 %v1312_v10  ;;  %v285_v10 = vld [vmem:[#allocation5 + $0x708] sm:$0xff]  ;;  %v303_v51 = vld [vmem:[#allocation5 + $0x798] sm:$0xff]  ;;  %v212_v52 = vld [vmem:[#allocation5 + $0x4c0] sm:$0xff] }
  0x7b   :  { %526 = vmatmul.mubr.f32.vlgmr.msra.gmra.mrb[0].mxu1 %v1744_v17  ;;  %v215_v53 = vld [vmem:[#allocation5 + $0x4d8] sm:$0xff]  ;;  %v310_v55 = vld [vmem:[#allocation5 + $0x7d0] sm:$0xff]  ;;  %v164_v59 = vld [vmem:[#allocation5 + $0x340] sm:$0xff] }
  0x7c   :  { %597 = vmatmul.mubr.f32.vlgmr.msra.gmra.mrb[0].mxu0 %v1746_v18  ;;  %1443 = vmatpush3.bf16.msra.mxu1 %v1442_v20  ;;  %v288_v20 = vld [vmem:[#allocation5 + $0x720] sm:$0xff]  ;;  %v307_v54 = vld [vmem:[#allocation5 + $0x7b8] sm:$0xff]  ;;  %v306_v58 = vld [vmem:[#allocation5 + $0x7b0] sm:$0xff] }
  0x7d   :  { %1315 = vmatpush1.bf16.msra.mxu0 %v1314_v21  ;;  %1445 = vmatprep.subr.bf16.mxu1 %v1444_v22  ;;  %v1334_v21 = vpack.c.bf16 %v285_v10, %v282_v6  ;;  %v1464_v22 = vpack.c.bf16 %v149_v12, %v146_v11  ;;  %v167_v60 = vld [vmem:[#allocation5 + $0x358] sm:$0xff]  ;;  %v309_v62 = vld [vmem:[#allocation5 + $0x7c8] sm:$0xff]  ;;  %v218_v63 = vld [vmem:[#allocation5 + $0x4f0] sm:$0xff] }
  0x7e   :  { %1317 = vmatprep.subr.bf16.mxu0 %v1316_v26  ;;  %809 = vmatprep.mubr.f32.mxu1 %v1738_v16  ;;  %v1454_v16 = vpack.c.bf16 %v83_v49, %v80_v48  ;;  %v1336_v26 = vpack.c.bf16 %v292_v14, %v289_v13  ;;  %v158_v48 = vld [vmem:[#allocation5 + $0x310] sm:$0xff]  ;;  %v161_v49 = vld [vmem:[#allocation5 + $0x328] sm:$0xff]  ;;  %v316_v2 = vld [vmem:[#allocation5 + $0x800] sm:$0xff] }
  0x7f   :  { %667 = vmatprep.mubr.f32.mxu0 %v1751_v29  ;;  %v221_v0 = vld [vmem:[#allocation5 + $0x508] sm:$0xff]  ;;  %v312_v6 = vld [vmem:[#allocation5 + $0x7e0] sm:$0xff]  ;;  %v170_v7 = vld [vmem:[#allocation5 + $0x370] sm:$0xff] }
  0x80   :  { %1447 = vmatpush3.bf16.msra.mxu1 %v1446_v32  ;;  %v1466_v32 = vpack.c.bf16 %v101_v25, %v98_v24  ;;  %v313_v1 = vld [vmem:[#allocation5 + $0x7e8] sm:$0xff]  ;;  %v315_v10 = vld [vmem:[#allocation5 + $0x7f8] sm:$0xff]  ;;  %v224_v11 = vld [vmem:[#allocation5 + $0x520] sm:$0xff] }
  0x81   :  { %1319 = vmatpush1.bf16.msra.mxu0 %v1318_v33  ;;  %1449 = vmatprep.subr.bf16.mxu1 %v1448_v34  ;;  %v1338_v33 = vpack.c.bf16 %v291_v23, %v288_v20  ;;  %v1468_v34 = vpack.c.bf16 %v155_v28, %v152_v27  ;;  %v173_v8 = vld [vmem:[#allocation5 + $0x388] sm:$0xff]  ;;  %v227_v12 = vld [vmem:[#allocation5 + $0x538] sm:$0xff]  ;;  %v318_v20 = vld [vmem:[#allocation5 + $0x810] sm:$0xff] }
  0x82   :  { %1321 = vmatprep.subr.bf16.mxu0 %v1320_v38  ;;  %v1340_v38 = vpack.c.bf16 %v298_v31, %v295_v30  ;;  %v319_v13 = vld [vmem:[#allocation5 + $0x818] sm:$0xff]  ;;  %v1482_v14 = vpack.c.bf16 %v173_v8, %v170_v7  ;;  %v321_v24 = vld [vmem:[#allocation5 + $0x828] sm:$0xff]  ;;  %v230_v25 = vld [vmem:[#allocation5 + $0x550] sm:$0xff] }
  0x83   :  { %v325_v27 = vld [vmem:[#allocation5 + $0x848] sm:$0xff]  ;;  %v328_v28 = vld [vmem:[#allocation5 + $0x860] sm:$0xff]  ;;  %v1358_v31 = vpack.c.bf16 %v321_v24, %v318_v20  ;;  %v311_v24 = vld [vmem:[#allocation5 + $0x7d8] sm:$0xff] }
  0x84   :  { %1451 = vmatpush3.bf16.msra.mxu1 %v1450_v44  ;;  %v1470_v44 = vpack.c.bf16 %v107_v37, %v104_v36  ;;  %v1360_v36 = vpack.c.bf16 %v328_v28, %v325_v27  ;;  %v327_v37 = vld [vmem:[#allocation5 + $0x858] sm:$0xff]  ;;  %v345_v8 = vld [vmem:[#allocation5 + $0x8e8] sm:$0xff]  ;;  %v1756_v27 = vld [vmem:[#allocation2 + $0x20] sm:$0xff] }
  0x85   :  { %1323 = vmatpush1.bf16.msra.mxu0 %v1322_v45  ;;  %1453 = vmatprep.subr.bf16.mxu1 %v1452_v46  ;;  %v1342_v45 = vpack.c.bf16 %v297_v39, %v294_v35  ;;  %v1472_v46 = vpack.c.bf16 %v209_v41, %v206_v40  ;;  %v185_v35 = vld [vmem:[#allocation5 + $0x3e8] sm:$0xff]  ;;  %v239_v39 = vld [vmem:[#allocation5 + $0x598] sm:$0xff]  ;;  %v334_v41 = vld [vmem:[#allocation5 + $0x890] sm:$0xff] }
  0x86   :  { %1325 = vmatprep.subr.bf16.mxu0 %v1324_v50  ;;  %v1344_v50 = vpack.c.bf16 %v304_v43, %v301_v42  ;;  %v331_v40 = vld [vmem:[#allocation5 + $0x878] sm:$0xff]  ;;  %v257_v20 = vld [vmem:[#allocation5 + $0x628] sm:$0xff] }
  0x88   :  { %1455 = vmatpush3.bf16.msra.mxu1 %v1454_v16  ;;  %v1474_v16 = vpack.c.bf16 %v161_v49, %v158_v48  ;;  %v1364_v48 = vpack.c.bf16 %v334_v41, %v331_v40  ;;  %v333_v49 = vld [vmem:[#allocation5 + $0x888] sm:$0xff]  ;;  %v364_v40 = vld [vmem:[#allocation5 + $0x980] sm:$0xff] }
  0x89   :  { %1327 = vmatpush1.bf16.msra.mxu0 %v1326_v56  ;;  %1457 = vmatprep.subr.bf16.mxu1 %v1456_v57  ;;  %v1346_v56 = vpack.c.bf16 %v303_v51, %v300_v47  ;;  %v1476_v57 = vpack.c.bf16 %v215_v53, %v212_v52  ;;  %v191_v47 = vld [vmem:[#allocation5 + $0x418] sm:$0xff]  ;;  %v245_v51 = vld [vmem:[#allocation5 + $0x5c8] sm:$0xff]  ;;  %v340_v53 = vld [vmem:[#allocation5 + $0x8c0] sm:$0xff] }
  0x8a   :  { %1329 = vmatprep.subr.bf16.mxu0 %v1328_v61  ;;  %v1348_v61 = vpack.c.bf16 %v310_v55, %v307_v54  ;;  %v337_v52 = vld [vmem:[#allocation5 + $0x8a8] sm:$0xff] }
  0x8c   :  { %1459 = vmatpush3.bf16.msra.mxu1 %v1458_v3  ;;  %v1478_v3 = vpack.c.bf16 %v167_v60, %v164_v59  ;;  %v1368_v59 = vpack.c.bf16 %v340_v53, %v337_v52  ;;  %v339_v60 = vld [vmem:[#allocation5 + $0x8b8] sm:$0xff]  ;;  %v370_v52 = vld [vmem:[#allocation5 + $0x9b0] sm:$0xff] }
  0x8d   :  { %1331 = vmatpush1.bf16.msra.mxu0 %v1330_v4  ;;  %1461 = vmatprep.subr.bf16.mxu1 %v1460_v5  ;;  %v1350_v4 = vpack.c.bf16 %v309_v62, %v306_v58  ;;  %v1480_v5 = vpack.c.bf16 %v221_v0, %v218_v63  ;;  %v197_v58 = vld [vmem:[#allocation5 + $0x448] sm:$0xff]  ;;  %v251_v62 = vld [vmem:[#allocation5 + $0x5f8] sm:$0xff]  ;;  %v346_v0 = vld [vmem:[#allocation5 + $0x8f0] sm:$0xff] }
  0x8e   :  { %1333 = vmatprep.subr.bf16.mxu0 %v1332_v9  ;;  %v1352_v9 = vpack.c.bf16 %v316_v2, %v313_v1  ;;  %v343_v63 = vld [vmem:[#allocation5 + $0x8d8] sm:$0xff] }
  0x8f   :  { %v1372_v7 = vpack.c.bf16 %v346_v0, %v343_v63 }
  0x90   :  { %1463 = vmatpush3.bf16.msra.mxu1 %v1462_v15  ;;  %v1354_v15 = vpack.c.bf16 %v315_v10, %v312_v6  ;;  %v203_v6 = vld [vmem:[#allocation5 + $0x478] sm:$0xff]  ;;  %v305_v10 = vld [vmem:[#allocation5 + $0x7a8] sm:$0xff] }
  0x91   :  { %1335 = vmatpush1.bf16.msra.mxu0 %v1334_v21  ;;  %1465 = vmatprep.subr.bf16.mxu1 %v1464_v22  ;;  %v176_v21 = vld [vmem:[#allocation5 + $0x3a0] sm:$0xff]  ;;  %v179_v22 = vld [vmem:[#allocation5 + $0x3b8] sm:$0xff] }
  0x92   :  { %1337 = vmatprep.subr.bf16.mxu0 %v1336_v26  ;;  %v233_v26 = vld [vmem:[#allocation5 + $0x568] sm:$0xff]  ;;  %v1486_v30 = vpack.c.bf16 %v179_v22, %v176_v21  ;;  %v351_v22 = vld [vmem:[#allocation5 + $0x918] sm:$0xff] }
  0x94   :  { %1467 = vmatpush3.bf16.msra.mxu1 %v1466_v32  ;;  %v1488_v32 = vpack.c.bf16 %v233_v26, %v230_v25  ;;  %v355_v25 = vld [vmem:[#allocation5 + $0x938] sm:$0xff]  ;;  %v358_v26 = vld [vmem:[#allocation5 + $0x950] sm:$0xff] }
  0x95   :  { %1339 = vmatpush1.bf16.msra.mxu0 %v1338_v33  ;;  %1469 = vmatprep.subr.bf16.mxu1 %v1468_v34  ;;  %v324_v33 = vld [vmem:[#allocation5 + $0x840] sm:$0xff]  ;;  %v182_v34 = vld [vmem:[#allocation5 + $0x3d0] sm:$0xff] }
  0x96   :  { %1341 = vmatprep.subr.bf16.mxu0 %v1340_v38  ;;  %v236_v38 = vld [vmem:[#allocation5 + $0x580] sm:$0xff]  ;;  %v1490_v42 = vpack.c.bf16 %v185_v35, %v182_v34  ;;  %v1362_v43 = vpack.c.bf16 %v327_v37, %v324_v33  ;;  %v263_v34 = vld [vmem:[#allocation5 + $0x658] sm:$0xff]  ;;  %v1380_v35 = vpack.c.bf16 %v358_v26, %v355_v25  ;;  %v314_v37 = vld [vmem:[#allocation5 + $0x7f0] sm:$0xff] }
  0x97   :  { %v260_v33 = vld [vmem:[#allocation5 + $0x640] sm:$0xff] }
  0x98   :  { %1471 = vmatpush3.bf16.msra.mxu1 %v1470_v44  ;;  %v1492_v44 = vpack.c.bf16 %v239_v39, %v236_v38  ;;  %v317_v38 = vld [vmem:[#allocation5 + $0x808] sm:$0xff]  ;;  %v1510_v41 = vpack.c.bf16 %v263_v34, %v260_v33  ;;  %v387_v34 = vld [vmem:[#allocation5 + $0xa38] sm:$0xff] }
  0x99   :  { %1343 = vmatpush1.bf16.msra.mxu0 %v1342_v45  ;;  %1473 = vmatprep.subr.bf16.mxu1 %v1472_v46  ;;  %v330_v45 = vld [vmem:[#allocation5 + $0x870] sm:$0xff]  ;;  %v188_v46 = vld [vmem:[#allocation5 + $0x400] sm:$0xff]  ;;  %v361_v39 = vld [vmem:[#allocation5 + $0x968] sm:$0xff] }
  0x9a   :  { %1345 = vmatprep.subr.bf16.mxu0 %v1344_v50  ;;  %v242_v50 = vld [vmem:[#allocation5 + $0x5b0] sm:$0xff]  ;;  %v1494_v54 = vpack.c.bf16 %v191_v47, %v188_v46  ;;  %v1366_v55 = vpack.c.bf16 %v333_v49, %v330_v45  ;;  %v360_v45 = vld [vmem:[#allocation5 + $0x960] sm:$0xff]  ;;  %v269_v47 = vld [vmem:[#allocation5 + $0x688] sm:$0xff] }
  0x9b   :  { %810 = vmatmul.mubr.f32.vlgmr.msra.gmra.mrb[2].mxu1 %v1744_v17  ;;  %v322_v17 = vld [vmem:[#allocation5 + $0x830] sm:$0xff]  ;;  %v363_v49 = vld [vmem:[#allocation5 + $0x978] sm:$0xff] }
  0x9c   :  { %1475 = vmatpush3.bf16.msra.mxu1 %v1474_v16  ;;  %879 = vmatprep.mubr.f32.mxu1 %v1741_v19  ;;  %v1484_v19 = vpack.c.bf16 %v227_v12, %v224_v11  ;;  %v1356_v23 = vpack.c.bf16 %v322_v17, %v319_v13  ;;  %v1496_v16 = vpack.c.bf16 %v245_v51, %v242_v50  ;;  %v349_v11 = vld [vmem:[#allocation5 + $0x908] sm:$0xff]  ;;  %v352_v12 = vld [vmem:[#allocation5 + $0x920] sm:$0xff]  ;;  %v266_v46 = vld [vmem:[#allocation5 + $0x670] sm:$0xff] }
  0x9d   :  { %1347 = vmatpush1.bf16.msra.mxu0 %v1346_v56  ;;  %1477 = vmatprep.subr.bf16.mxu1 %v1476_v57  ;;  %v336_v56 = vld [vmem:[#allocation5 + $0x8a0] sm:$0xff]  ;;  %v194_v57 = vld [vmem:[#allocation5 + $0x430] sm:$0xff]  ;;  %v1376_v21 = vpack.c.bf16 %v352_v12, %v349_v11  ;;  %v367_v51 = vld [vmem:[#allocation5 + $0x998] sm:$0xff]  ;;  %v1514_v53 = vpack.c.bf16 %v269_v47, %v266_v46 }
  0x9e   :  { %1349 = vmatprep.subr.bf16.mxu0 %v1348_v61  ;;  %v248_v61 = vld [vmem:[#allocation5 + $0x5e0] sm:$0xff]  ;;  %v1498_v1 = vpack.c.bf16 %v197_v58, %v194_v57  ;;  %v1370_v2 = vpack.c.bf16 %v339_v60, %v336_v56  ;;  %v275_v57 = vld [vmem:[#allocation5 + $0x6b8] sm:$0xff]  ;;  %v1388_v58 = vpack.c.bf16 %v370_v52, %v367_v51  ;;  %v326_v60 = vld [vmem:[#allocation5 + $0x850] sm:$0xff] }
  0x9f   :  { %v320_v50 = vld [vmem:[#allocation5 + $0x820] sm:$0xff]  ;;  %v393_v47 = vld [vmem:[#allocation5 + $0xa68] sm:$0xff] }
  0xa0   :  { %1479 = vmatpush3.bf16.msra.mxu1 %v1478_v3  ;;  %v1500_v3 = vpack.c.bf16 %v251_v62, %v248_v61  ;;  %v272_v56 = vld [vmem:[#allocation5 + $0x6a0] sm:$0xff]  ;;  %v329_v61 = vld [vmem:[#allocation5 + $0x868] sm:$0xff] }
  0xa1   :  { %1351 = vmatpush1.bf16.msra.mxu0 %v1350_v4  ;;  %1481 = vmatprep.subr.bf16.mxu1 %v1480_v5  ;;  %v342_v4 = vld [vmem:[#allocation5 + $0x8d0] sm:$0xff]  ;;  %v200_v5 = vld [vmem:[#allocation5 + $0x460] sm:$0xff]  ;;  %v373_v62 = vld [vmem:[#allocation5 + $0x9c8] sm:$0xff]  ;;  %v1518_v63 = vpack.c.bf16 %v275_v57, %v272_v56 }
  0xa2   :  { %1353 = vmatprep.subr.bf16.mxu0 %v1352_v9  ;;  %v302_v9 = vld [vmem:[#allocation5 + $0x790] sm:$0xff]  ;;  %v1502_v13 = vpack.c.bf16 %v203_v6, %v200_v5  ;;  %v1374_v17 = vpack.c.bf16 %v345_v8, %v342_v4  ;;  %v281_v4 = vld [vmem:[#allocation5 + $0x6e8] sm:$0xff]  ;;  %v375_v6 = vld [vmem:[#allocation5 + $0x9d8] sm:$0xff] }
  0xa3   :  { %v335_v8 = vld [vmem:[#allocation5 + $0x898] sm:$0xff] }
  0xa4   :  { %1483 = vmatpush3.bf16.msra.mxu1 %v1482_v14  ;;  %v1504_v14 = vpack.c.bf16 %v305_v10, %v302_v9  ;;  %v379_v9 = vld [vmem:[#allocation5 + $0x9f8] sm:$0xff]  ;;  %v382_v10 = vld [vmem:[#allocation5 + $0xa10] sm:$0xff] }
  0xa5   :  { %1355 = vmatpush1.bf16.msra.mxu0 %v1354_v15  ;;  %1485 = vmatprep.subr.bf16.mxu1 %v1484_v19  ;;  %v348_v15 = vld [vmem:[#allocation5 + $0x900] sm:$0xff]  ;;  %v254_v19 = vld [vmem:[#allocation5 + $0x610] sm:$0xff]  ;;  %v399_v57 = vld [vmem:[#allocation5 + $0xa98] sm:$0xff] }
  0xa6   :  { %1357 = vmatprep.subr.bf16.mxu0 %v1356_v23  ;;  %v308_v23 = vld [vmem:[#allocation5 + $0x7c0] sm:$0xff]  ;;  %v1506_v28 = vpack.c.bf16 %v257_v20, %v254_v19  ;;  %v1396_v19 = vpack.c.bf16 %v382_v10, %v379_v9  ;;  %v381_v20 = vld [vmem:[#allocation5 + $0xa08] sm:$0xff] }
  0xa8   :  { %1487 = vmatpush3.bf16.msra.mxu1 %v1486_v30  ;;  %v1378_v30 = vpack.c.bf16 %v351_v22, %v348_v15  ;;  %v287_v15 = vld [vmem:[#allocation5 + $0x718] sm:$0xff]  ;;  %v341_v22 = vld [vmem:[#allocation5 + $0x8c8] sm:$0xff] }
  0xa9   :  { %1359 = vmatpush1.bf16.msra.mxu0 %v1358_v31  ;;  %1489 = vmatprep.subr.bf16.mxu1 %v1488_v32  ;;  %v1508_v31 = vpack.c.bf16 %v311_v24, %v308_v23  ;;  %v354_v32 = vld [vmem:[#allocation5 + $0x930] sm:$0xff]  ;;  %v385_v23 = vld [vmem:[#allocation5 + $0xa28] sm:$0xff]  ;;  %v388_v24 = vld [vmem:[#allocation5 + $0xa40] sm:$0xff] }
  0xaa   :  { %1361 = vmatprep.subr.bf16.mxu0 %v1360_v36  ;;  %v357_v36 = vld [vmem:[#allocation5 + $0x948] sm:$0xff]  ;;  %v1400_v33 = vpack.c.bf16 %v388_v24, %v385_v23  ;;  %v414_v24 = vld [vmem:[#allocation5 + $0xb10] sm:$0xff] }
  0xac   :  { %1491 = vmatpush3.bf16.msra.mxu1 %v1490_v42  ;;  %v1760_v42 = vld [vmem:[#allocation2 + $0x38] sm:$0xff] }
  0xad   :  { %1363 = vmatpush1.bf16.msra.mxu0 %v1362_v43  ;;  %1493 = vmatprep.subr.bf16.mxu1 %v1492_v44  ;;  %v1382_v43 = vpack.c.bf16 %v357_v36, %v354_v32  ;;  %v1512_v44 = vpack.c.bf16 %v317_v38, %v314_v37  ;;  %v293_v32 = vld [vmem:[#allocation5 + $0x748] sm:$0xff]  ;;  %v347_v36 = vld [vmem:[#allocation5 + $0x8f8] sm:$0xff]  ;;  %v394_v38 = vld [vmem:[#allocation5 + $0xa70] sm:$0xff] }
  0xae   :  { %1365 = vmatprep.subr.bf16.mxu0 %v1364_v48  ;;  %v1384_v48 = vpack.c.bf16 %v364_v40, %v361_v39  ;;  %v391_v37 = vld [vmem:[#allocation5 + $0xa58] sm:$0xff] }
  0xaf   :  { %v1404_v46 = vpack.c.bf16 %v394_v38, %v391_v37  ;;  %v420_v38 = vld [vmem:[#allocation5 + $0xb40] sm:$0xff] }
  0xb0   :  { %1495 = vmatpush3.bf16.msra.mxu1 %v1494_v54  ;;  %v1386_v54 = vpack.c.bf16 %v363_v49, %v360_v45  ;;  %v299_v45 = vld [vmem:[#allocation5 + $0x778] sm:$0xff]  ;;  %v401_v49 = vld [vmem:[#allocation5 + $0xaa8] sm:$0xff] }
  0xb1   :  { %1367 = vmatpush1.bf16.msra.mxu0 %v1366_v55  ;;  %1497 = vmatprep.subr.bf16.mxu1 %v1496_v16  ;;  %v366_v16 = vld [vmem:[#allocation5 + $0x990] sm:$0xff] }
  0xb2   :  { %1369 = vmatprep.subr.bf16.mxu0 %v1368_v59  ;;  %v369_v59 = vld [vmem:[#allocation5 + $0x9a8] sm:$0xff] }
  0xb3   :  { %v1390_v0 = vpack.c.bf16 %v369_v59, %v366_v16  ;;  %v353_v16 = vld [vmem:[#allocation5 + $0x928] sm:$0xff]  ;;  %v407_v59 = vld [vmem:[#allocation5 + $0xad8] sm:$0xff] }
  0xb4   :  { %1499 = vmatpush3.bf16.msra.mxu1 %v1498_v1  ;;  %v1520_v1 = vpack.c.bf16 %v329_v61, %v326_v60  ;;  %v403_v60 = vld [vmem:[#allocation5 + $0xab8] sm:$0xff]  ;;  %v406_v61 = vld [vmem:[#allocation5 + $0xad0] sm:$0xff] }
  0xb5   :  { %1371 = vmatpush1.bf16.msra.mxu0 %v1370_v2  ;;  %1501 = vmatprep.subr.bf16.mxu1 %v1500_v3  ;;  %v372_v2 = vld [vmem:[#allocation5 + $0x9c0] sm:$0xff]  ;;  %v278_v3 = vld [vmem:[#allocation5 + $0x6d0] sm:$0xff] }
  0xb6   :  { %1373 = vmatprep.subr.bf16.mxu0 %v1372_v7  ;;  %v332_v7 = vld [vmem:[#allocation5 + $0x880] sm:$0xff]  ;;  %v1522_v11 = vpack.c.bf16 %v281_v4, %v278_v3  ;;  %v1394_v12 = vpack.c.bf16 %v375_v6, %v372_v2  ;;  %v359_v2 = vld [vmem:[#allocation5 + $0x958] sm:$0xff]  ;;  %v1412_v3 = vpack.c.bf16 %v406_v61, %v403_v60  ;;  %v405_v4 = vld [vmem:[#allocation5 + $0xac8] sm:$0xff] }
  0xb7   :  { %v413_v6 = vld [vmem:[#allocation5 + $0xb08] sm:$0xff]  ;;  %v432_v61 = vld [vmem:[#allocation5 + $0xba0] sm:$0xff] }
  0xb8   :  { %1503 = vmatpush3.bf16.msra.mxu1 %v1502_v13  ;;  %v1524_v13 = vpack.c.bf16 %v335_v8, %v332_v7  ;;  %v409_v7 = vld [vmem:[#allocation5 + $0xae8] sm:$0xff]  ;;  %v412_v8 = vld [vmem:[#allocation5 + $0xb00] sm:$0xff] }
  0xb9   :  { %1375 = vmatpush1.bf16.msra.mxu0 %v1374_v17  ;;  %1505 = vmatprep.subr.bf16.mxu1 %v1504_v14  ;;  %v378_v17 = vld [vmem:[#allocation5 + $0x9f0] sm:$0xff]  ;;  %v284_v14 = vld [vmem:[#allocation5 + $0x700] sm:$0xff] }
  0xba   :  { %1377 = vmatprep.subr.bf16.mxu0 %v1376_v21  ;;  %v338_v21 = vld [vmem:[#allocation5 + $0x8b0] sm:$0xff]  ;;  %v1526_v25 = vpack.c.bf16 %v287_v15, %v284_v14  ;;  %v1398_v26 = vpack.c.bf16 %v381_v20, %v378_v17  ;;  %v365_v17 = vld [vmem:[#allocation5 + $0x988] sm:$0xff]  ;;  %v1416_v14 = vpack.c.bf16 %v412_v8, %v409_v7  ;;  %v411_v15 = vld [vmem:[#allocation5 + $0xaf8] sm:$0xff] }
  0xbb   :  { %880 = vmatmul.mubr.f32.vlgmr.msra.gmra.mrb[4].mxu1 %v1746_v18  ;;  %v323_v18 = vld [vmem:[#allocation5 + $0x838] sm:$0xff]  ;;  %v392_v8 = vld [vmem:[#allocation5 + $0xa60] sm:$0xff] }
  0xbc   :  { %668 = vmatmul.mubr.f32.vlgmr.msra.gmra.mrb[0].mxu0 %v1756_v27  ;;  %1507 = vmatpush3.bf16.msra.mxu1 %v1506_v28  ;;  %v1516_v55 = vpack.c.bf16 %v323_v18, %v320_v50  ;;  %v1528_v28 = vpack.c.bf16 %v341_v22, %v338_v21  ;;  %v397_v50 = vld [vmem:[#allocation5 + $0xa88] sm:$0xff]  ;;  %v400_v18 = vld [vmem:[#allocation5 + $0xaa0] sm:$0xff]  ;;  %v419_v20 = vld [vmem:[#allocation5 + $0xb38] sm:$0xff] }
  0xbd   :  { %1379 = vmatpush1.bf16.msra.mxu0 %v1378_v30  ;;  %1509 = vmatprep.subr.bf16.mxu1 %v1508_v31  ;;  %v384_v30 = vld [vmem:[#allocation5 + $0xa20] sm:$0xff]  ;;  %v290_v31 = vld [vmem:[#allocation5 + $0x730] sm:$0xff]  ;;  %v1408_v56 = vpack.c.bf16 %v400_v18, %v397_v50  ;;  %v415_v21 = vld [vmem:[#allocation5 + $0xb18] sm:$0xff] }
  0xbe   :  { %1381 = vmatprep.subr.bf16.mxu0 %v1380_v35  ;;  %949 = vmatprep.mubr.f32.mxu1 %v1751_v29  ;;  %v376_v29 = vld [vmem:[#allocation5 + $0x9e0] sm:$0xff]  ;;  %v1530_v39 = vpack.c.bf16 %v293_v32, %v290_v31  ;;  %v1402_v40 = vpack.c.bf16 %v387_v34, %v384_v30  ;;  %v417_v30 = vld [vmem:[#allocation5 + $0xb28] sm:$0xff]  ;;  %v422_v31 = vld [vmem:[#allocation5 + $0xb50] sm:$0xff] }
  0xbf   :  { %738 = vmatprep.mubr.f32.mxu0 %v1760_v42  ;;  %v1392_v5 = vpack.c.bf16 %v376_v29, %v373_v62  ;;  %v344_v35 = vld [vmem:[#allocation5 + $0x8e0] sm:$0xff]  ;;  %v425_v32 = vld [vmem:[#allocation5 + $0xb68] sm:$0xff]  ;;  %v426_v18 = vld [vmem:[#allocation5 + $0xb70] sm:$0xff] }
  0xc0   :  { %1511 = vmatpush3.bf16.msra.mxu1 %v1510_v41  ;;  %v1532_v41 = vpack.c.bf16 %v347_v36, %v344_v35  ;;  %v424_v34 = vld [vmem:[#allocation5 + $0xb60] sm:$0xff]  ;;  %v1422_v36 = vpack.c.bf16 %v417_v30, %v414_v24  ;;  %v1552_v37 = vpack.c.bf16 %v425_v32, %v422_v31 }
  0xc1   :  { %1383 = vmatpush1.bf16.msra.mxu0 %v1382_v43  ;;  %1513 = vmatprep.subr.bf16.mxu1 %v1512_v44  ;;  %v390_v43 = vld [vmem:[#allocation5 + $0xa50] sm:$0xff]  ;;  %v296_v44 = vld [vmem:[#allocation5 + $0x760] sm:$0xff] }
  0xc2   :  { %1385 = vmatprep.subr.bf16.mxu0 %v1384_v48  ;;  %v398_v48 = vld [vmem:[#allocation5 + $0xa90] sm:$0xff]  ;;  %v1534_v51 = vpack.c.bf16 %v299_v45, %v296_v44  ;;  %v1406_v52 = vpack.c.bf16 %v393_v47, %v390_v43  ;;  %v423_v43 = vld [vmem:[#allocation5 + $0xb58] sm:$0xff]  ;;  %v428_v44 = vld [vmem:[#allocation5 + $0xb80] sm:$0xff] }
  0xc3   :  { %v431_v45 = vld [vmem:[#allocation5 + $0xb98] sm:$0xff]  ;;  %v430_v47 = vld [vmem:[#allocation5 + $0xb90] sm:$0xff]  ;;  %v444_v24 = vld [vmem:[#allocation7] sm:$0x7] }
  0xc4   :  { %1515 = vmatpush3.bf16.msra.mxu1 %v1514_v53  ;;  %v1536_v53 = vpack.c.bf16 %v401_v49, %v398_v48  ;;  %v1426_v49 = vpack.c.bf16 %v423_v43, %v420_v38  ;;  %v1556_v50 = vpack.c.bf16 %v431_v45, %v428_v44 }
  0xc5   :  { %1387 = vmatpush1.bf16.msra.mxu0 %v1386_v54  ;;  %1517 = vmatprep.subr.bf16.mxu1 %v1516_v55  ;;  %v396_v54 = vld [vmem:[#allocation5 + $0xa80] sm:$0xff]  ;;  %v350_v55 = vld [vmem:[#allocation5 + $0x910] sm:$0xff] }
  0xc6   :  { %1389 = vmatprep.subr.bf16.mxu0 %v1388_v58  ;;  %v404_v58 = vld [vmem:[#allocation5 + $0xac0] sm:$0xff]  ;;  %v1538_v62 = vpack.c.bf16 %v353_v16, %v350_v55  ;;  %v1410_v29 = vpack.c.bf16 %v399_v57, %v396_v54  ;;  %v429_v54 = vld [vmem:[#allocation5 + $0xb88] sm:$0xff]  ;;  %v434_v55 = vld [vmem:[#allocation5 + $0xbb0] sm:$0xff] }
  0xc7   :  { %v437_v16 = vld [vmem:[#allocation5 + $0xbc8] sm:$0xff]  ;;  %v436_v57 = vld [vmem:[#allocation5 + $0xbc0] sm:$0xff] }
  0xc8   :  { %1519 = vmatpush3.bf16.msra.mxu1 %v1518_v63  ;;  %v1540_v63 = vpack.c.bf16 %v407_v59, %v404_v58  ;;  %v1430_v59 = vpack.c.bf16 %v429_v54, %v426_v18  ;;  %v1560_v60 = vpack.c.bf16 %v437_v16, %v434_v55 }
  0xc9   :  { %1391 = vmatpush1.bf16.msra.mxu0 %v1390_v0  ;;  %1521 = vmatprep.subr.bf16.mxu1 %v1520_v1  ;;  %v402_v0 = vld [vmem:[#allocation5 + $0xab0] sm:$0xff]  ;;  %v356_v1 = vld [vmem:[#allocation5 + $0x940] sm:$0xff] }
  0xca   :  { %1393 = vmatprep.subr.bf16.mxu0 %v1392_v5  ;;  %v410_v5 = vld [vmem:[#allocation5 + $0xaf0] sm:$0xff]  ;;  %v1542_v9 = vpack.c.bf16 %v359_v2, %v356_v1  ;;  %v1414_v10 = vpack.c.bf16 %v405_v4, %v402_v0  ;;  %v435_v0 = vld [vmem:[#allocation5 + $0xbb8] sm:$0xff]  ;;  %v440_v1 = vld [vmem:[#allocation5 + $0xbe0] sm:$0xff] }
  0xcb   :  { %v443_v2 = vld [vmem:[#allocation5 + $0xbf8] sm:$0xff]  ;;  %v442_v4 = vld [vmem:[#allocation5 + $0xbf0] sm:$0xff] }
  0xcc   :  { %1523 = vmatpush3.bf16.msra.mxu1 %v1522_v11  ;;  %v1544_v11 = vpack.c.bf16 %v413_v6, %v410_v5  ;;  %v1434_v6 = vpack.c.bf16 %v435_v0, %v432_v61  ;;  %v1564_v7 = vpack.c.bf16 %v443_v2, %v440_v1 }
  0xcd   :  { %1395 = vmatpush1.bf16.msra.mxu0 %v1394_v12  ;;  %1525 = vmatprep.subr.bf16.mxu1 %v1524_v13  ;;  %v408_v12 = vld [vmem:[#allocation5 + $0xae0] sm:$0xff]  ;;  %v362_v13 = vld [vmem:[#allocation5 + $0x970] sm:$0xff] }
  0xce   :  { %1397 = vmatprep.subr.bf16.mxu0 %v1396_v19  ;;  %v416_v19 = vld [vmem:[#allocation5 + $0xb20] sm:$0xff]  ;;  %v1546_v22 = vpack.c.bf16 %v365_v17, %v362_v13  ;;  %v1418_v23 = vpack.c.bf16 %v411_v15, %v408_v12  ;;  %v441_v12 = vld [vmem:[#allocation5 + $0xbe8] sm:$0xff] }
  0xd0   :  { %1527 = vmatpush3.bf16.msra.mxu1 %v1526_v25  ;;  %v368_v25 = vld [vmem:[#allocation5 + $0x9a0] sm:$0xff] }
  0xd1   :  { %1399 = vmatpush1.bf16.msra.mxu0 %v1398_v26  ;;  %1529 = vmatprep.subr.bf16.mxu1 %v1528_v28  ;;  %v371_v26 = vld [vmem:[#allocation5 + $0x9b8] sm:$0xff] }
  0xd2   :  { %1401 = vmatprep.subr.bf16.mxu0 %v1400_v33  ;;  %v421_v33 = vld [vmem:[#allocation5 + $0xb48] sm:$0xff]  ;;  %v1550_v35 = vpack.c.bf16 %v371_v26, %v368_v25 }
  0xd4   :  { %1531 = vmatpush3.bf16.msra.mxu1 %v1530_v39  ;;  %v374_v39 = vld [vmem:[#allocation5 + $0x9d0] sm:$0xff] }
  0xd5   :  { %1403 = vmatpush1.bf16.msra.mxu0 %v1402_v40  ;;  %1533 = vmatprep.subr.bf16.mxu1 %v1532_v41  ;;  %v377_v40 = vld [vmem:[#allocation5 + $0x9e8] sm:$0xff]  ;;  %v1424_v41 = vpack.c.bf16 %v424_v34, %v421_v33 }
  0xd6   :  { %1405 = vmatprep.subr.bf16.mxu0 %v1404_v46  ;;  %v427_v46 = vld [vmem:[#allocation5 + $0xb78] sm:$0xff]  ;;  %v1554_v48 = vpack.c.bf16 %v377_v40, %v374_v39 }
  0xd8   :  { %1535 = vmatpush3.bf16.msra.mxu1 %v1534_v51  ;;  %v380_v51 = vld [vmem:[#allocation5 + $0xa00] sm:$0xff] }
  0xd9   :  { %1407 = vmatpush1.bf16.msra.mxu0 %v1406_v52  ;;  %1537 = vmatprep.subr.bf16.mxu1 %v1536_v53  ;;  %v383_v52 = vld [vmem:[#allocation5 + $0xa18] sm:$0xff]  ;;  %v1428_v53 = vpack.c.bf16 %v430_v47, %v427_v46 }
  0xda   :  { %1409 = vmatprep.subr.bf16.mxu0 %v1408_v56  ;;  %v433_v56 = vld [vmem:[#allocation5 + $0xba8] sm:$0xff]  ;;  %v1558_v58 = vpack.c.bf16 %v383_v52, %v380_v51 }
  0xdb   :  { %950 = vmatmul.mubr.f32.vlgmr.msra.gmra.mrb[6].mxu1 %v1756_v27  ;;  %v418_v27 = vld [vmem:[#allocation5 + $0xb30] sm:$0xff] }
  0xdc   :  { %1539 = vmatpush3.bf16.msra.mxu1 %v1538_v62  ;;  %1019 = vmatprep.mubr.f32.mxu1 %v1760_v42  ;;  %v1548_v42 = vpack.c.bf16 %v419_v20, %v416_v19  ;;  %v1420_v28 = vpack.c.bf16 %v418_v27, %v415_v21  ;;  %v386_v62 = vld [vmem:[#allocation5 + $0xa30] sm:$0xff] }
  0xdd   :  { %1411 = vmatpush1.bf16.msra.mxu0 %v1410_v29  ;;  %1541 = vmatprep.subr.bf16.mxu1 %v1540_v63  ;;  %v389_v29 = vld [vmem:[#allocation5 + $0xa48] sm:$0xff]  ;;  %v1432_v63 = vpack.c.bf16 %v436_v57, %v433_v56 }
  0xde   :  { %1413 = vmatprep.subr.bf16.mxu0 %v1412_v3  ;;  %v439_v3 = vld [vmem:[#allocation5 + $0xbd8] sm:$0xff]  ;;  %v1562_v5 = vpack.c.bf16 %v389_v29, %v386_v62 }
  0xe0   :  { %1543 = vmatpush3.bf16.msra.mxu1 %v1542_v9  ;;  %v395_v9 = vld [vmem:[#allocation5 + $0xa78] sm:$0xff] }
  0xe1   :  { %1415 = vmatpush1.bf16.msra.mxu0 %v1414_v10  ;;  %1545 = vmatprep.subr.bf16.mxu1 %v1544_v11  ;;  %v1436_v10 = vpack.c.bf16 %v442_v4, %v439_v3  ;;  %v438_v11 = vld [vmem:[#allocation5 + $0xbd0] sm:$0xff]  ;;  %v1566_v13 = vpack.c.bf16 %v395_v9, %v392_v8 }
  0xe2   :  { %1417 = vmatprep.subr.bf16.mxu0 %v1416_v14  ;;  %v1438_v17 = vpack.c.bf16 %v441_v12, %v438_v11  ;;  %v58_v14 = vld [vmem:[#allocation2 + $0x30] sm:$0xff] }
  0xe4   :  { %1547 = vmatpush3.bf16.msra.mxu1 %v1546_v22  ;;  %v446_v22 = vlaneseq }
  0xe5   :  { %1419 = vmatpush1.bf16.msra.mxu0 %v1418_v23  ;;  %1549 = vmatprep.subr.bf16.mxu1 %v1548_v42 }
  0xe6   :  { %1421 = vmatprep.subr.bf16.mxu0 %v1420_v28  ;;  %v447_v23 = vshrl.u32 %v446_v22, 7 }
  0xe8   :  { %1551 = vmatpush3.bf16.msra.mxu1 %v1550_v35  ;;  %v456_v42 = vsub.s32 2, %v447_v23  ;;  %v452_v38 = vsub.s32 1, %v447_v23 }
  0xe9   :  { %1423 = vmatpush1.bf16.msra.mxu0 %v1422_v36  ;;  %1553 = vmatprep.subr.bf16.mxu1 %v1552_v37  ;;  %v448_v37 = vsub.s32 0, %v447_v23 }
  0xea   :  { %1425 = vmatprep.subr.bf16.mxu0 %v1424_v41  ;;  %v457_v25 = vrot.slane %v444_v24, %v456_v42  ;;  %v453_v40 = vrot.slane %v444_v24, %v452_v38 }
  0xeb   :  { %v449_v39 = vrot.slane %v444_v24, %v448_v37 }
  0xec   :  { %1555 = vmatpush3.bf16.msra.mxu1 %v1554_v48 }
  0xed   :  { %1427 = vmatpush1.bf16.msra.mxu0 %v1426_v49  ;;  %1557 = vmatprep.subr.bf16.mxu1 %v1556_v50 }
  0xee   :  { %1429 = vmatprep.subr.bf16.mxu0 %v1428_v53 }
  0xf0   :  { %1559 = vmatpush3.bf16.msra.mxu1 %v1558_v58 }
  0xf1   :  { %1431 = vmatpush1.bf16.msra.mxu0 %v1430_v59  ;;  %1561 = vmatprep.subr.bf16.mxu1 %v1560_v60 }
  0xf2   :  { %1433 = vmatprep.subr.bf16.mxu0 %v1432_v63 }
  0xf4   :  { %1563 = vmatpush3.bf16.msra.mxu1 %v1562_v5 }
  0xf5   :  { %1435 = vmatpush1.bf16.msra.mxu0 %v1434_v6  ;;  %1565 = vmatprep.subr.bf16.mxu1 %v1564_v7 }
  0xf6   :  { %1437 = vmatprep.subr.bf16.mxu0 %v1436_v10 }
  0xf8   :  { %1567 = vmatpush3.bf16.msra.mxu1 %v1566_v13 }
  0xf9   :  { %1439 = vmatpush1.bf16.msra.mxu0 %v1438_v17 }
  0xfb   :  { %1020 = vmatmul.mubr.f32.vlgmr.msra.gmra.mrb[8].mxu1 %v58_v14 }
  0xfc   :  { %739 = vmatmul.mubr.f32.vlgmr.msra.gmra.mrb[0].mxu0 %v58_v14 }
 0x14e   :  { %v527_v15 = vpop.f32.mrb[0].mxu1 }
 0x14f   :  { %v529_v19 = vpop.f32.mrb[1].mxu1  ;;  %v528_v41 = vadd.f32 %v527_v15, %v449_v39 }
 0x150   :  { %v530_v44 = vadd.f32 %v529_v19, %v453_v40 }
 0x16e   :  { %v1076_v20 = vpop.f32.mrb[2].mxu1 }
 0x16f   :  { %v1077_v21 = vpop.f32.mrb[3].mxu1 }
 0x170   :  { %v1078_v27 = vadd.f32 %v1077_v21, %v1076_v20 }
 0x172   :  { %v812_v30 = vadd.f32 %v1078_v27, %v457_v25 }
 0x18e   :  { %v1111_v26 = vpop.f32.mrb[4].mxu1 }
 0x18f   :  { %v1112_v28 = vpop.f32.mrb[5].mxu1 }
 0x190   :  { %v1113_v31 = vadd.f32 %v1112_v28, %v1111_v26 }
 0x192   :  { %v882_v32 = vadd.f32 %v1113_v31, %v812_v30 }
 0x1ae   :  { %v1146_v33 = vpop.f32.mrb[6].mxu1 }
 0x1af   :  { %v1147_v34 = vpop.f32.mrb[7].mxu1 }
 0x1b0   :  { %v1148_v35 = vadd.f32 %v1147_v34, %v1146_v33 }
 0x1b2   :  { %v952_v36 = vadd.f32 %v1148_v35, %v882_v32 }
 0x1ce   :  { %v1181_v43 = vpop.f32.mrb[8].mxu1 }
 0x1cf   :  { %v740_v45 = vpop.f32.mrb[0].mxu0  ;;  %v1182_v46 = vpop.f32.mrb[9].mxu1 }
 0x1d0   :  { %v1569_v47 = vadd.f32 %v740_v45, %v528_v41  ;;  %v742_v48 = vpop.f32.mrb[1].mxu0  ;;  %v1183_v49 = vadd.f32 %v1182_v46, %v1181_v43 }
 0x1d1   :  { %v1571_v50 = vadd.f32 %v742_v48, %v530_v44 }
 0x1d2   :  { %1025 = vst [vmem:[#allocation8] sm:$0xff] %v1569_v47  ;;  %v1022_v18 = vadd.f32 %v1183_v49, %v952_v36 }
 0x1d3   :  { %1026 = vst [vmem:[#allocation8 + $0x8] sm:$0xff] %v1571_v50 }
 0x1d4   :  { %1027 = vst [vmem:[#allocation8 + $0x10] sm:$0xff] %v1022_v18 }
 0x1d5   :  { %1659 = shalt.err (!%p1656_p0)
}
 0x1d6   :  { %s1660_s26 = scalar_lea.hbm %s1781_s3, 384 }
 0x1d7   :  { %p1661_p1 = scmp.ne.s32.totalorder %s1781_s3, %s1660_s26  ;;  %p1664_p2 = scmp.lt.u32.totalorder %s1660_s26, %s1781_s3 }
 0x1d9   :  { %p1666_p3 = pnand %p1664_p2, %p1661_p1 }
 0x1db   :  { %1669 = shalt.err (!%p1666_p3)
}
 0x1dc   :  { %1037 = dma.vmem_to_hbm [thread:$0]  %s1035_s22, 384, %s1781_s3, [#allocation4]  }
 0x1dd   :  { %1674 = dma.done.wait [#allocation4], 384  }
 0x1de   :  { %1675 = vsyncadd [#allocation4], 4294966912 }
 0x1df   :  { %1041 = vsyncpa [#allocation3], 1 }
 0x1e0   :  { %1042 = vsyncpa [#allocation6], 1 }
 0x1e1   :  { %1043 = vsyncpa [#allocation4], 1 }

</bundles_post_ra>
